<compile_context>
chip_gen: v7x
topology: tpu7x:2x2x1
jax: 0.10.0
libtpu: 0.0.40
codegen_flags: <defaults>
</compile_context>

<pallas_src>
import jax
import jax.numpy as jnp
from jax.experimental import pallas as pl
from jax.experimental.pallas import tpu as pltpu


def _round_up(x, m):
    return (x + m - 1) // m * m


def _linear_kernel(x_ref, w_ref, b_ref, o_ref, acc_ref):
    # x_ref: (TM, TK) tile, w_ref: (TK, TN) tile, b_ref: (1, TN),
    # o_ref: (TM, TN), acc_ref: (TM, TN) f32 scratch accumulator.
    k = pl.program_id(2)

    @pl.when(k == 0)
    def _init():
        acc_ref[...] = jnp.zeros_like(acc_ref)

    acc_ref[...] += jnp.dot(x_ref[...], w_ref[...],
                            preferred_element_type=jnp.float32)

    @pl.when(k == pl.num_programs(2) - 1)
    def _finalize():
        out = acc_ref[...] + b_ref[...].astype(jnp.float32)
        o_ref[...] = out.astype(o_ref.dtype)


def sequence_wise_linear(x, w, b, *, tm=512, tn=512, tk=512):
    """Applies y = x @ w + b sequence-wise (SequenceWise(nn.Linear)).

    x: (T, N, H_in)  -> returns (T, N, H_out)
    w: (H_in, H_out)
    b: (H_out,)
    """
    t, n, h_in = x.shape
    h_out = w.shape[1]
    m = t * n

    # --- tile sizing / padding (lane-dense, sublane-aligned) ---------------
    itemsize = jnp.dtype(x.dtype).itemsize
    sublane = 16 if itemsize == 2 else 8          # bf16 packs 2 rows/sublane
    tm = min(tm, _round_up(m, sublane))
    m_pad = _round_up(m, tm)

    h_in_pad = _round_up(h_in, 128)
    tk = min(tk, h_in_pad)
    h_in_pad = _round_up(h_in_pad, tk)            # K grid divides evenly

    h_out_pad = _round_up(h_out, 128)
    tn = min(tn, h_out_pad)
    h_out_pad = _round_up(h_out_pad, tn)          # N grid divides evenly

    # --- glue: flatten + zero-pad (zeros contribute nothing to the matmul) -
    x2 = x.reshape(m, h_in)
    x2 = jnp.pad(x2, ((0, m_pad - m), (0, h_in_pad - h_in)))
    w2 = jnp.pad(w, ((0, h_in_pad - h_in), (0, h_out_pad - h_out)))
    b2 = jnp.pad(b, (0, h_out_pad - h_out)).reshape(1, h_out_pad)

    grid = (m_pad // tm, h_out_pad // tn, h_in_pad // tk)

    # --- VMEM budget: double-buffered tiles + f32 accumulator + headroom ---
    out_itemsize = jnp.dtype(x.dtype).itemsize
    tile_bytes = (2 * tm * tk * itemsize            # x tiles (double-buffered)
                  + 2 * tk * tn * itemsize          # w tiles
                  + 2 * 8 * tn * itemsize           # bias (sublane-padded)
                  + 2 * tm * tn * out_itemsize      # out tiles
                  + tm * tn * 4)                    # accumulator scratch
    vmem_limit = min(max(2 * tile_bytes, 32 * 1024 * 1024), 64 * 1024 * 1024)

    cost = pl.CostEstimate(
        flops=2 * m * h_in * h_out,
        transcendentals=0,
        bytes_accessed=(m * h_in + h_in * h_out + h_out) * itemsize
        + m * h_out * out_itemsize,
    )

    out2 = pl.pallas_call(
        _linear_kernel,
        out_shape=jax.ShapeDtypeStruct((m_pad, h_out_pad), x.dtype),
        grid_spec=pltpu.PrefetchScalarGridSpec(
            num_scalar_prefetch=0,
            grid=grid,
            in_specs=[
                pl.BlockSpec((tm, tk), lambda i, j, k: (i, k)),
                pl.BlockSpec((tk, tn), lambda i, j, k: (k, j)),
                pl.BlockSpec((1, tn), lambda i, j, k: (0, j)),
            ],
            out_specs=pl.BlockSpec((tm, tn), lambda i, j, k: (i, j)),
            scratch_shapes=[pltpu.VMEM((tm, tn), jnp.float32)],
        ),
        compiler_params=pltpu.CompilerParams(
            dimension_semantics=("parallel", "parallel", "arbitrary"),
            vmem_limit_bytes=int(vmem_limit),
        ),
        cost_estimate=cost,
    )(x2, w2, b2)

    # Slice away the M / H_out padding and expand back to (T, N, H_out).
    return out2[:m, :h_out].reshape(t, n, h_out)


if __name__ == "__main__":
    # Small shapes consistent with the module: seq T=8, batch N=2, hidden H=32.
    T, N, H_IN, H_OUT = 8, 2, 32, 32

    key = jax.random.PRNGKey(0)
    kx, kw, kb = jax.random.split(key, 3)

    x = jax.random.normal(kx, (T, N, H_IN), dtype=jnp.float32)
    # Deterministic "Linear" parameters (synthetic init, no checkpoint load).
    w = jax.random.normal(kw, (H_IN, H_OUT), dtype=jnp.float32) * (1.0 / H_IN ** 0.5)
    b = jax.random.normal(kb, (H_OUT,), dtype=jnp.float32) * 0.01

    fn = jax.jit(sequence_wise_linear)
    y = fn(x, w, b)
    y = jax.block_until_ready(y)

    # Reference check in plain JAX (same semantics as SequenceWise(nn.Linear)).
    ref = (x.reshape(T * N, H_IN) @ w + b).reshape(T, N, H_OUT)
    assert y.shape == (T, N, H_OUT)
    assert jnp.allclose(y, ref, atol=1e-5, rtol=1e-5)

    print("KERNEL_OK")
</pallas_src>

<mosaic_0001>
module attributes {stable_mosaic.version = 11 : i64} {
  func.func @_linear_kernel(%arg0: i32, %arg1: i32, %arg2: i32, %arg3: memref<16x128xf32, #tpu.memory_space<vmem>>, %arg4: memref<128x128xf32, #tpu.memory_space<vmem>>, %arg5: memref<1x128xf32, #tpu.memory_space<vmem>>, %arg6: memref<16x128xf32, #tpu.memory_space<vmem>>, %arg7: memref<16x128xf32, #tpu.memory_space<vmem>>) attributes {dimension_semantics = [#tpu.dimension_semantics<parallel>, #tpu.dimension_semantics<parallel>, #tpu.dimension_semantics<arbitrary>], iteration_bounds = array<i64: 1, 1, 1>, scalar_prefetch = 0 : i64, scratch_operands = 1 : i64, tpu.core_type = #tpu.core_type<tc>, window_params = [{transform_indices = @transform_0, window_bounds = array<i64: 16, 128>}, {transform_indices = @transform_1, window_bounds = array<i64: 128, 128>}, {transform_indices = @transform_2, window_bounds = array<i64: 1, 128>}, {transform_indices = @transform_3, window_bounds = array<i64: 16, 128>}]} {
    %c0_i32 = arith.constant 0 : i32
    %0 = arith.cmpi eq, %arg2, %c0_i32 : i32
    %1 = arith.extui %0 : i1 to i32
    %c0_i32_0 = arith.constant 0 : i32
    %2 = arith.cmpi ne, %1, %c0_i32_0 : i32
    scf.if %2 {
      %cst_10 = arith.constant 0.000000e+00 : f32
      %12 = vector.broadcast %cst_10 : f32 to vector<16x128xf32>
      %c0_11 = arith.constant 0 : index
      %c0_12 = arith.constant 0 : index
      %13 = vector.load %arg7[%c0_11, %c0_12] : memref<16x128xf32, #tpu.memory_space<vmem>>, vector<16x128xf32>
      tpu.vector_store %arg7[%c0_11, %c0_12], %12 {strides = array<i32>} : memref<16x128xf32, #tpu.memory_space<vmem>>, vector<16x128xf32>,
    } else {
    }
    %c0 = arith.constant 0 : index
    %c0_1 = arith.constant 0 : index
    %3 = vector.load %arg7[%c0, %c0_1] : memref<16x128xf32, #tpu.memory_space<vmem>>, vector<16x128xf32>
    %c0_2 = arith.constant 0 : index
    %c0_3 = arith.constant 0 : index
    %4 = vector.load %arg3[%c0_2, %c0_3] : memref<16x128xf32, #tpu.memory_space<vmem>>, vector<16x128xf32>
    %c0_4 = arith.constant 0 : index
    %c0_5 = arith.constant 0 : index
    %5 = vector.load %arg4[%c0_4, %c0_5] : memref<128x128xf32, #tpu.memory_space<vmem>>, vector<128x128xf32>
    %cst = arith.constant dense<0.000000e+00> : vector<16x128xf32>
    %6 = tpu.matmul %4, %5, %cst {dimension_numbers = #tpu.dot_dimension_numbers<[1], [0], [0], [1], [0, 0, 1, 1], [], []>} : vector<16x128xf32>, vector<128x128xf32>, vector<16x128xf32> -> vector<16x128xf32>
    %7 = arith.addf %3, %6 : vector<16x128xf32>
    %c0_6 = arith.constant 0 : index
    %c0_7 = arith.constant 0 : index
    %8 = vector.load %arg7[%c0_6, %c0_7] : memref<16x128xf32, #tpu.memory_space<vmem>>, vector<16x128xf32>
    tpu.vector_store %arg7[%c0_6, %c0_7], %7 {strides = array<i32>} : memref<16x128xf32, #tpu.memory_space<vmem>>, vector<16x128xf32>,
    %c0_i32_8 = arith.constant 0 : i32
    %9 = arith.cmpi eq, %arg2, %c0_i32_8 : i32
    %10 = arith.extui %9 : i1 to i32
    %c0_i32_9 = arith.constant 0 : i32
    %11 = arith.cmpi ne, %10, %c0_i32_9 : i32
    scf.if %11 {
      %c0_10 = arith.constant 0 : index
      %c0_11 = arith.constant 0 : index
      %12 = vector.load %arg7[%c0_10, %c0_11] : memref<16x128xf32, #tpu.memory_space<vmem>>, vector<16x128xf32>
      %c0_12 = arith.constant 0 : index
      %c0_13 = arith.constant 0 : index
      %13 = vector.load %arg5[%c0_12, %c0_13] : memref<1x128xf32, #tpu.memory_space<vmem>>, vector<1x128xf32>
      %14 = vector.broadcast %13 : vector<1x128xf32> to vector<16x128xf32>
      %15 = arith.addf %12, %14 : vector<16x128xf32>
      %c0_14 = arith.constant 0 : index
      %c0_15 = arith.constant 0 : index
      %16 = vector.load %arg6[%c0_14, %c0_15] : memref<16x128xf32, #tpu.memory_space<vmem>>, vector<16x128xf32>
      tpu.vector_store %arg6[%c0_14, %c0_15], %15 {strides = array<i32>} : memref<16x128xf32, #tpu.memory_space<vmem>>, vector<16x128xf32>,
    } else {
    }
    return
  }
  func.func @transform_0(%arg0: i32, %arg1: i32, %arg2: i32) -> (i32, i32) {
    %c0_i32 = arith.constant 0 : i32
    return %arg0, %arg2 : i32, i32
  }
  func.func @transform_1(%arg0: i32, %arg1: i32, %arg2: i32) -> (i32, i32) {
    %c0_i32 = arith.constant 0 : i32
    return %arg2, %arg1 : i32, i32
  }
  func.func @transform_2(%arg0: i32, %arg1: i32, %arg2: i32) -> (i32, i32) {
    %c0_i32 = arith.constant 0 : i32
    %c0_i32_0 = arith.constant 0 : i32
    return %c0_i32, %arg1 : i32, i32
  }
  func.func @transform_3(%arg0: i32, %arg1: i32, %arg2: i32) -> (i32, i32) {
    %c0_i32 = arith.constant 0 : i32
    return %arg0, %arg1 : i32, i32
  }
}

</mosaic_0001>

<bundles_post_ra>
// kernel: sequence_wise_linear.1
= control target key start
LH: loop header
LB: loop body
LE: loop exit
PB: predicated region body
PF: predicated region fallthrough
CT: control target
= control target key end

     0   :  { %s357_s0 = inlined_call_operand.vmem [shape: f32[16,128], index: 0, kind: input, shape index: {}]   ;;  %s358_s1 = inlined_call_operand.vmem [shape: f32[128,128], index: 1, kind: input, shape index: {}]   ;;  %s359_s2 = inlined_call_operand.vmem [shape: f32[1,128], index: 2, kind: input, shape index: {}]   ;;  %s360_s3 = inlined_call_operand.hbm [shape: f32[16,128], index: 3, kind: output, shape index: {}]  }
   0x1   :  { %v25_v0 = vld [vmem:[%s358_s1] sm:$0xff]  ;;  %v26_v1 = vld [vmem:[%s358_s1 + $0x8] sm:$0xff]  ;;  %v27_v2 = vld [vmem:[%s358_s1 + $0x10] sm:$0xff] }
   0x2   :  { %v206_v3 = vpack.c.bf16 %v26_v1, %v25_v0  ;;  %v28_v4 = vld [vmem:[%s358_s1 + $0x18] sm:$0xff]  ;;  %v29_v6 = vld [vmem:[%s358_s1 + $0x20] sm:$0xff]  ;;  %v30_v7 = vld [vmem:[%s358_s1 + $0x28] sm:$0xff] }
   0x3   :  { %v210_v5 = vpack.c.bf16 %v28_v4, %v27_v2  ;;  %v214_v8 = vpack.c.bf16 %v30_v7, %v29_v6  ;;  %v23_v9 = vld [vmem:[%s357_s0] sm:$0xff]  ;;  %v31_v10 = vld [vmem:[%s358_s1 + $0x30] sm:$0xff]  ;;  %v32_v11 = vld [vmem:[%s358_s1 + $0x38] sm:$0xff] }
   0x4   :  { %207 = vmatprep.subr.bf16.mxu0 %v206_v3  ;;  %203 = vmatprep.mubr.f32.mxu0 %v23_v9 }
   0x5   :  { %209 = vmatpush3.bf16.msra.mxu0 %v206_v3 }
   0x6   :  { %211 = vmatprep.subr.bf16.mxu0 %v210_v5 }
   0x7   :  { %8 = vsyncpa [#allocation4], 0  ;;  %v218_v12 = vpack.c.bf16 %v32_v11, %v31_v10  ;;  %v33_v13 = vld [vmem:[%s358_s1 + $0x40] sm:$0xff]  ;;  %v34_v14 = vld [vmem:[%s358_s1 + $0x48] sm:$0xff]  ;;  %s265_s23 = smov [#allocation3]  }
   0x8   :  { %v222_v15 = vpack.c.bf16 %v34_v14, %v33_v13  ;;  %v35_v16 = vld [vmem:[%s358_s1 + $0x50] sm:$0xff]  ;;  %v36_v17 = vld [vmem:[%s358_s1 + $0x58] sm:$0xff]  ;;  %v37_v19 = vld [vmem:[%s358_s1 + $0x60] sm:$0xff]  ;;  %s141_s24 = sshll.u32 %s265_s23, 4  ;;  %s142_s24 = int_to_ptr.vmem [resolvable:$true] %s141_s24 }
   0x9   :  { %213 = vmatpush3.bf16.msra.mxu0 %v210_v5  ;;  %v226_v18 = vpack.c.bf16 %v36_v17, %v35_v16  ;;  %v38_v20 = vld [vmem:[%s358_s1 + $0x68] sm:$0xff]  ;;  %v39_v22 = vld [vmem:[%s358_s1 + $0x70] sm:$0xff]  ;;  %v40_v23 = vld [vmem:[%s358_s1 + $0x78] sm:$0xff]  ;;  %s241_s1 = scalar_lea.vmem %s142_s24, 256  ;;  %p246_p1 = scmp.lt.s32.totalorder %s142_s24, %s142_s24 }
   0xa   :  { %215 = vmatprep.subr.bf16.mxu0 %v214_v8  ;;  %v230_v21 = vpack.c.bf16 %v38_v20, %v37_v19  ;;  %v234_v24 = vpack.c.bf16 %v40_v23, %v39_v22  ;;  %v24_v25 = vld [vmem:[%s357_s0 + $0x8] sm:$0xff]  ;;  %v152_v26 = vld [vmem:[%s359_s2] ss:$0 sm:$0xff]  ;;  %p242_p0 = scmp.ne.s32.totalorder %s142_s24, %s241_s1  ;;  %p247_p2 = scmp.lt.s32.totalorder %s241_s1, %s241_s1 }
   0xc   :  { %p248_p3 = por %p247_p2, %p246_p1 }
   0xd   :  { %217 = vmatpush3.bf16.msra.mxu0 %v214_v8 }
   0xe   :  { %219 = vmatprep.subr.bf16.mxu0 %v218_v12  ;;  %p249_p4 = pnand %p248_p3, %p242_p0 }
  0x11   :  { %221 = vmatpush3.bf16.msra.mxu0 %v218_v12 }
  0x12   :  { %223 = vmatprep.subr.bf16.mxu0 %v222_v15 }
  0x15   :  { %225 = vmatpush3.bf16.msra.mxu0 %v222_v15 }
  0x16   :  { %227 = vmatprep.subr.bf16.mxu0 %v226_v18 }
  0x19   :  { %229 = vmatpush3.bf16.msra.mxu0 %v226_v18 }
  0x1a   :  { %231 = vmatprep.subr.bf16.mxu0 %v230_v21 }
  0x1d   :  { %233 = vmatpush3.bf16.msra.mxu0 %v230_v21 }
  0x1e   :  { %235 = vmatprep.subr.bf16.mxu0 %v234_v24 }
  0x21   :  { %237 = vmatpush3.bf16.msra.mxu0 %v234_v24 }
  0x24   :  { %204 = vmatmul.mubr.f32.vlgmr.msra.gmra.mrb[0].mxu0 %v24_v25 }
  0xf7   :  { %v205_v27 = vpop.f32.mrb[0].mxu0 }
  0xf8   :  { %v133_v28 = vadd.f32 %v205_v27, %v152_v26  ;;  %v107_v29 = vpop.f32.mrb[1].mxu0 }
  0xf9   :  { %v132_v30 = vadd.f32 %v152_v26, %v107_v29 }
  0xfa   :  { %135 = vst [vmem:[#allocation3 + $0x8] sm:$0xff] %v133_v28 }
  0xfb   :  { %134 = vst [vmem:[#allocation3] sm:$0xff] %v132_v30 }
  0xfc   :  { %252 = shalt.err (!%p249_p4)
}
  0xfd   :  { %s253_s2 = scalar_lea.hbm %s360_s3, 256 }
  0xfe   :  { %p254_p5 = scmp.ne.s32.totalorder %s360_s3, %s253_s2  ;;  %p257_p6 = scmp.lt.u32.totalorder %s253_s2, %s360_s3 }
 0x100   :  { %p259_p7 = pnand %p257_p6, %p254_p5 }
 0x102   :  { %262 = shalt.err (!%p259_p7)
}
 0x103   :  { %s266_s30 = smov 128   ;;  %s267_s4 = smov 8  }
 0x104   :  { %147 = dma.vmem_to_hbm [thread:$0]  %s142_s24, 256, %s360_s3, [#allocation4], %s266_s30, %s266_s30, %s267_s4  }
 0x105   :  { %263 = dma.done.wait [#allocation4], 256  }
 0x106   :  { %264 = vsyncadd [#allocation4], 4294967040 }
 0x107   :  { %151 = vsyncpa [#allocation4], 1 }

</bundles_post_ra>
